<compile_context>
chip_gen: v7x
topology: tpu7x:2x2x1
jax: 0.10.0
libtpu: 0.0.40
codegen_flags: <defaults>
</compile_context>

<pallas_src>
import functools

import jax
import jax.numpy as jnp
from jax import lax
from jax.experimental import pallas as pl
from jax.experimental.pallas import tpu as pltpu


def _ffn_postln_kernel(x_ref, w1_ref, b1_ref, w2_ref, b2_ref, g_ref, beta_ref,
                       o_ref, acc_ref, *, d_valid, eps):
    """Grid = (row_tiles, ffn_chunks); acc_ref accumulates fc2 output in f32."""
    k = pl.program_id(1)

    @pl.when(k == 0)
    def _init():
        acc_ref[...] = jnp.zeros_like(acc_ref)

    # fc1 chunk + bias + ReLU. Matmul operands stay in their native dtype
    # (bf16-friendly on v6e/v7x MXU); accumulation is f32.
    h = jnp.dot(x_ref[...], w1_ref[...], preferred_element_type=jnp.float32)
    h = jnp.maximum(h + b1_ref[...].astype(jnp.float32), 0.0)

    # fc2 chunk, accumulated into the f32 scratch accumulator.
    acc_ref[...] += jnp.dot(h.astype(w2_ref.dtype), w2_ref[...],
                            preferred_element_type=jnp.float32)

    @pl.when(k == pl.num_programs(1) - 1)
    def _finalize():
        d_pad = o_ref.shape[-1]
        # residual add (f32)
        r = (acc_ref[...] + b2_ref[...].astype(jnp.float32)
             + x_ref[...].astype(jnp.float32))

        if d_pad != d_valid:
            # Padded feature lanes are exact zeros (zero-padded x, W2 cols, b2),
            # so sums are unaffected; just divide by the true feature count and
            # mask the centered values so they don't pollute the variance.
            lane = lax.broadcasted_iota(jnp.int32, (1, d_pad), 1)
            valid = lane < d_valid
            mean = jnp.sum(r, axis=-1, keepdims=True) / d_valid
            c = jnp.where(valid, r - mean, 0.0)
            var = jnp.sum(c * c, axis=-1, keepdims=True) / d_valid
        else:
            mean = jnp.mean(r, axis=-1, keepdims=True)
            c = r - mean
            var = jnp.mean(c * c, axis=-1, keepdims=True)

        inv = lax.rsqrt(var + eps)
        out = c * inv * g_ref[...].astype(jnp.float32) \
            + beta_ref[...].astype(jnp.float32)
        o_ref[...] = out.astype(o_ref.dtype)


def _round_up(x, m):
    return (x + m - 1) // m * m


def reformer_ffn2d_sublayer(x, w1, b1, w2, b2, gamma, beta, *,
                            tm=512, tf=1024):
    """Post-LN FFN sublayer.

    x: (seq_len, batch, embed_dim); w1: (D, F); w2: (F, D); b1: (F,) or (1,F);
    b2/gamma/beta: (D,) or (1,D).  Returns ((seq_len, batch, embed_dim), None).
    """
    S, B, D = x.shape
    F = w1.shape[1]
    assert w1.shape == (D, F) and w2.shape == (F, D)

    N = S * B

    # ---- lane-dense / tile-aligned padded sizes --------------------------
    D_pad = _round_up(D, 128)
    tf = _round_up(min(tf, _round_up(F, 128)), 128)   # FFN chunk (mult of 128)
    F_pad = _round_up(F, tf)
    tm = _round_up(min(tm, _round_up(N, 8)), 8)        # row tile (mult of 8)
    N_pad = _round_up(N, tm)

    def pad2(a, rows, cols):
        return jnp.pad(a, ((0, rows - a.shape[0]), (0, cols - a.shape[1])))

    x_p = pad2(x.reshape(N, D), N_pad, D_pad)
    w1_p = pad2(w1, D_pad, F_pad)
    b1_p = pad2(b1.reshape(1, -1), 1, F_pad)
    w2_p = pad2(w2, F_pad, D_pad)
    b2_p = pad2(b2.reshape(1, -1), 1, D_pad)
    g_p = pad2(gamma.reshape(1, -1), 1, D_pad)
    beta_p = pad2(beta.reshape(1, -1), 1, D_pad)

    grid = (N_pad // tm, F_pad // tf)

    itemsize = jnp.dtype(x.dtype).itemsize
    cost = pl.CostEstimate(
        flops=int(4 * N_pad * D_pad * F_pad),            # two matmuls
        transcendentals=int(N_pad),                      # rsqrt per row
        bytes_accessed=int(2 * N_pad * D_pad * itemsize
                           + (w1_p.size + w2_p.size)
                           * jnp.dtype(w1_p.dtype).itemsize),
    )

    out_p = pl.pallas_call(
        functools.partial(_ffn_postln_kernel, d_valid=D, eps=1e-5),
        out_shape=jax.ShapeDtypeStruct((N_pad, D_pad), x.dtype),
        grid_spec=pltpu.PrefetchScalarGridSpec(
            num_scalar_prefetch=0,
            grid=grid,
            in_specs=[
                pl.BlockSpec((tm, D_pad), lambda i, k: (i, 0)),     # x tile
                pl.BlockSpec((D_pad, tf), lambda i, k: (0, k)),     # W1 chunk
                pl.BlockSpec((1, tf), lambda i, k: (0, k)),         # b1 chunk
                pl.BlockSpec((tf, D_pad), lambda i, k: (k, 0)),     # W2 chunk
                pl.BlockSpec((1, D_pad), lambda i, k: (0, 0)),      # b2
                pl.BlockSpec((1, D_pad), lambda i, k: (0, 0)),      # LN gamma
                pl.BlockSpec((1, D_pad), lambda i, k: (0, 0)),      # LN beta
            ],
            out_specs=pl.BlockSpec((tm, D_pad), lambda i, k: (i, 0)),
            scratch_shapes=[pltpu.VMEM((tm, D_pad), jnp.float32)],  # fc2 acc
        ),
        compiler_params=pltpu.CompilerParams(
            dimension_semantics=("parallel", "arbitrary"),
            vmem_limit_bytes=64 * 1024 * 1024,
        ),
        cost_estimate=cost,
    )(x_p, w1_p, b1_p, w2_p, b2_p, g_p, beta_p)

    return out_p[:N, :D].reshape(S, B, D), None


# ---------------------------------------------------------------------------
# Reference + demo
# ---------------------------------------------------------------------------
def _xavier_uniform(key, fan_in, fan_out, dtype=jnp.float32):
    # torch.nn.init.xavier_uniform_ on a (out, in) weight; stored transposed
    # (in, out) so the kernel computes x @ W directly.
    limit = (6.0 / (fan_in + fan_out)) ** 0.5
    return jax.random.uniform(key, (fan_in, fan_out), dtype=dtype,
                              minval=-limit, maxval=limit)


def _reference(x, w1, b1, w2, b2, gamma, beta):
    x32 = x.astype(jnp.float32)
    h = jax.nn.relu(x32 @ w1 + b1)
    y = h @ w2 + b2
    r = x32 + y
    mean = r.mean(-1, keepdims=True)
    var = ((r - mean) ** 2).mean(-1, keepdims=True)
    return ((r - mean) / jnp.sqrt(var + 1e-5)) * gamma + beta


def _run_case(key, seq, batch, embed, ffn, tm, tf):
    kx, k1, k2, kb1, kb2, kg, kbt = jax.random.split(key, 7)
    x = jax.random.normal(kx, (seq, batch, embed), dtype=jnp.float32)
    w1 = _xavier_uniform(k1, embed, ffn)
    b1 = 0.1 * jax.random.normal(kb1, (ffn,), jnp.float32)
    w2 = _xavier_uniform(k2, ffn, embed)
    b2 = 0.1 * jax.random.normal(kb2, (embed,), jnp.float32)
    gamma = 1.0 + 0.1 * jax.random.normal(kg, (embed,), jnp.float32)
    beta = 0.1 * jax.random.normal(kbt, (embed,), jnp.float32)

    out, attn = reformer_ffn2d_sublayer(x, w1, b1, w2, b2, gamma, beta,
                                        tm=tm, tf=tf)
    out = jax.block_until_ready(out)

    ref = _reference(x, w1, b1, w2, b2, gamma, beta)
    assert out.shape == (seq, batch, embed)
    assert attn is None
    assert jnp.allclose(out, ref, atol=2e-5, rtol=2e-5), "mismatch vs reference"


if __name__ == "__main__":
    key = jax.random.PRNGKey(0)
    k_a, k_b = jax.random.split(key)

    # Shapes consistent with the module's forward:
    #   x: (seq_len=8, batch=2, embed_dim=32), decoder_ffn_embed_dim=64
    _run_case(k_a, seq=8, batch=2, embed=32, ffn=64, tm=512, tf=1024)

    # A second case exercising row padding (N=15), D padding (48 -> 128) and
    # multi-chunk FFN accumulation (F=200 -> two 128-wide chunks).
    _run_case(k_b, seq=5, batch=3, embed=48, ffn=200, tm=8, tf=128)

    print("KERNEL_OK")
</pallas_src>

<mosaic_0001>
module attributes {stable_mosaic.version = 11 : i64} {
  func.func @_ffn_postln_kernel(%arg0: i32, %arg1: i32, %arg2: memref<16x128xf32, #tpu.memory_space<vmem>>, %arg3: memref<128x128xf32, #tpu.memory_space<vmem>>, %arg4: memref<1x128xf32, #tpu.memory_space<vmem>>, %arg5: memref<128x128xf32, #tpu.memory_space<vmem>>, %arg6: memref<1x128xf32, #tpu.memory_space<vmem>>, %arg7: memref<1x128xf32, #tpu.memory_space<vmem>>, %arg8: memref<1x128xf32, #tpu.memory_space<vmem>>, %arg9: memref<16x128xf32, #tpu.memory_space<vmem>>, %arg10: memref<16x128xf32, #tpu.memory_space<vmem>>) attributes {dimension_semantics = [#tpu.dimension_semantics<parallel>, #tpu.dimension_semantics<arbitrary>], iteration_bounds = array<i64: 1, 1>, scalar_prefetch = 0 : i64, scratch_operands = 1 : i64, tpu.core_type = #tpu.core_type<tc>, window_params = [{transform_indices = @transform_0, window_bounds = array<i64: 16, 128>}, {transform_indices = @transform_1, window_bounds = array<i64: 128, 128>}, {transform_indices = @transform_2, window_bounds = array<i64: 1, 128>}, {transform_indices = @transform_3, window_bounds = array<i64: 128, 128>}, {pipeline_mode = #tpu.pipeline_mode<synchronous>, transform_indices = @transform_4, window_bounds = array<i64: 1, 128>}, {pipeline_mode = #tpu.pipeline_mode<synchronous>, transform_indices = @transform_5, window_bounds = array<i64: 1, 128>}, {pipeline_mode = #tpu.pipeline_mode<synchronous>, transform_indices = @transform_6, window_bounds = array<i64: 1, 128>}, {transform_indices = @transform_7, window_bounds = array<i64: 16, 128>}]} {
    %c0_i32 = arith.constant 0 : i32
    %0 = arith.cmpi eq, %arg1, %c0_i32 : i32
    %1 = arith.extui %0 : i1 to i32
    %c0_i32_0 = arith.constant 0 : i32
    %2 = arith.cmpi ne, %1, %c0_i32_0 : i32
    scf.if %2 {
      %cst_16 = arith.constant 0.000000e+00 : f32
      %19 = vector.broadcast %cst_16 : f32 to vector<16x128xf32>
      %c0_17 = arith.constant 0 : index
      %c0_18 = arith.constant 0 : index
      %20 = vector.load %arg10[%c0_17, %c0_18] : memref<16x128xf32, #tpu.memory_space<vmem>>, vector<16x128xf32>
      tpu.vector_store %arg10[%c0_17, %c0_18], %19 {strides = array<i32>} : memref<16x128xf32, #tpu.memory_space<vmem>>, vector<16x128xf32>,
    } else {
    }
    %c0 = arith.constant 0 : index
    %c0_1 = arith.constant 0 : index
    %3 = vector.load %arg2[%c0, %c0_1] : memref<16x128xf32, #tpu.memory_space<vmem>>, vector<16x128xf32>
    %c0_2 = arith.constant 0 : index
    %c0_3 = arith.constant 0 : index
    %4 = vector.load %arg3[%c0_2, %c0_3] : memref<128x128xf32, #tpu.memory_space<vmem>>, vector<128x128xf32>
    %cst = arith.constant dense<0.000000e+00> : vector<16x128xf32>
    %5 = tpu.matmul %3, %4, %cst {dimension_numbers = #tpu.dot_dimension_numbers<[1], [0], [0], [1], [0, 0, 1, 1], [], []>} : vector<16x128xf32>, vector<128x128xf32>, vector<16x128xf32> -> vector<16x128xf32>
    %c0_4 = arith.constant 0 : index
    %c0_5 = arith.constant 0 : index
    %6 = vector.load %arg4[%c0_4, %c0_5] : memref<1x128xf32, #tpu.memory_space<vmem>>, vector<1x128xf32>
    %7 = vector.broadcast %6 : vector<1x128xf32> to vector<16x128xf32>
    %8 = arith.addf %5, %7 : vector<16x128xf32>
    %cst_6 = arith.constant 0.000000e+00 : f32
    %9 = vector.broadcast %cst_6 : f32 to vector<16x128xf32>
    %10 = arith.maximumf %8, %9 : vector<16x128xf32>
    %c0_7 = arith.constant 0 : index
    %c0_8 = arith.constant 0 : index
    %11 = vector.load %arg10[%c0_7, %c0_8] : memref<16x128xf32, #tpu.memory_space<vmem>>, vector<16x128xf32>
    %c0_9 = arith.constant 0 : index
    %c0_10 = arith.constant 0 : index
    %12 = vector.load %arg5[%c0_9, %c0_10] : memref<128x128xf32, #tpu.memory_space<vmem>>, vector<128x128xf32>
    %cst_11 = arith.constant dense<0.000000e+00> : vector<16x128xf32>
    %13 = tpu.matmul %10, %12, %cst_11 {dimension_numbers = #tpu.dot_dimension_numbers<[1], [0], [0], [1], [0, 0, 1, 1], [], []>} : vector<16x128xf32>, vector<128x128xf32>, vector<16x128xf32> -> vector<16x128xf32>
    %14 = arith.addf %11, %13 : vector<16x128xf32>
    %c0_12 = arith.constant 0 : index
    %c0_13 = arith.constant 0 : index
    %15 = vector.load %arg10[%c0_12, %c0_13] : memref<16x128xf32, #tpu.memory_space<vmem>>, vector<16x128xf32>
    tpu.vector_store %arg10[%c0_12, %c0_13], %14 {strides = array<i32>} : memref<16x128xf32, #tpu.memory_space<vmem>>, vector<16x128xf32>,
    %c0_i32_14 = arith.constant 0 : i32
    %16 = arith.cmpi eq, %arg1, %c0_i32_14 : i32
    %17 = arith.extui %16 : i1 to i32
    %c0_i32_15 = arith.constant 0 : i32
    %18 = arith.cmpi ne, %17, %c0_i32_15 : i32
    scf.if %18 {
      %c0_16 = arith.constant 0 : index
      %c0_17 = arith.constant 0 : index
      %19 = vector.load %arg10[%c0_16, %c0_17] : memref<16x128xf32, #tpu.memory_space<vmem>>, vector<16x128xf32>
      %c0_18 = arith.constant 0 : index
      %c0_19 = arith.constant 0 : index
      %20 = vector.load %arg6[%c0_18, %c0_19] : memref<1x128xf32, #tpu.memory_space<vmem>>, vector<1x128xf32>
      %21 = vector.broadcast %20 : vector<1x128xf32> to vector<16x128xf32>
      %22 = arith.addf %19, %21 : vector<16x128xf32>
      %c0_20 = arith.constant 0 : index
      %c0_21 = arith.constant 0 : index
      %23 = vector.load %arg2[%c0_20, %c0_21] : memref<16x128xf32, #tpu.memory_space<vmem>>, vector<16x128xf32>
      %24 = arith.addf %22, %23 : vector<16x128xf32>
      %25 = tpu.iota {dimensions = array<i32: 1>} : vector<1x128xi32>
      %c32_i32 = arith.constant 32 : i32
      %26 = vector.broadcast %c32_i32 : i32 to vector<1x128xi32>
      %27 = arith.cmpi slt, %25, %26 : vector<1x128xi32>
      %cst_22 = arith.constant dense<0.000000e+00> : vector<16xf32>
      %28 = vector.multi_reduction <add>, %24, %cst_22 [1] : vector<16x128xf32> to vector<16xf32>
      %29 = vector.shape_cast %28 : vector<16xf32> to vector<16x1xf32>
      %cst_23 = arith.constant 3.200000e+01 : f32
      %30 = vector.broadcast %cst_23 : f32 to vector<16x1xf32>
      %31 = arith.divf %29, %30 : vector<16x1xf32>
      %32 = vector.broadcast %31 : vector<16x1xf32> to vector<16x128xf32>
      %33 = arith.subf %24, %32 : vector<16x128xf32>
      %cst_24 = arith.constant 0.000000e+00 : f32
      %34 = vector.shape_cast %27 : vector<1x128xi1> to vector<1x128xi1>
      %35 = vector.broadcast %34 : vector<1x128xi1> to vector<16x128xi1>
      %36 = vector.broadcast %cst_24 : f32 to vector<16x128xf32>
      %37 = arith.select %35, %33, %36 : vector<16x128xi1>, vector<16x128xf32>
      %38 = arith.mulf %37, %37 : vector<16x128xf32>
      %cst_25 = arith.constant dense<0.000000e+00> : vector<16xf32>
      %39 = vector.multi_reduction <add>, %38, %cst_25 [1] : vector<16x128xf32> to vector<16xf32>
      %40 = vector.shape_cast %39 : vector<16xf32> to vector<16x1xf32>
      %cst_26 = arith.constant 3.200000e+01 : f32
      %41 = vector.broadcast %cst_26 : f32 to vector<16x1xf32>
      %42 = arith.divf %40, %41 : vector<16x1xf32>
      %cst_27 = arith.constant 9.99999974E-6 : f32
      %43 = vector.broadcast %cst_27 : f32 to vector<16x1xf32>
      %44 = arith.addf %42, %43 : vector<16x1xf32>
      %45 = math.rsqrt %44 : vector<16x1xf32>
      %46 = vector.broadcast %45 : vector<16x1xf32> to vector<16x128xf32>
      %47 = arith.mulf %37, %46 : vector<16x128xf32>
      %c0_28 = arith.constant 0 : index
      %c0_29 = arith.constant 0 : index
      %48 = vector.load %arg7[%c0_28, %c0_29] : memref<1x128xf32, #tpu.memory_space<vmem>>, vector<1x128xf32>
      %49 = vector.broadcast %48 : vector<1x128xf32> to vector<16x128xf32>
      %50 = arith.mulf %47, %49 : vector<16x128xf32>
      %c0_30 = arith.constant 0 : index
      %c0_31 = arith.constant 0 : index
      %51 = vector.load %arg8[%c0_30, %c0_31] : memref<1x128xf32, #tpu.memory_space<vmem>>, vector<1x128xf32>
      %52 = vector.broadcast %51 : vector<1x128xf32> to vector<16x128xf32>
      %53 = arith.addf %50, %52 : vector<16x128xf32>
      %c0_32 = arith.constant 0 : index
      %c0_33 = arith.constant 0 : index
      %54 = vector.load %arg9[%c0_32, %c0_33] : memref<16x128xf32, #tpu.memory_space<vmem>>, vector<16x128xf32>
      tpu.vector_store %arg9[%c0_32, %c0_33], %53 {strides = array<i32>} : memref<16x128xf32, #tpu.memory_space<vmem>>, vector<16x128xf32>,
    } else {
    }
    return
  }
  func.func @transform_0(%arg0: i32, %arg1: i32) -> (i32, i32) {
    %c0_i32 = arith.constant 0 : i32
    %c0_i32_0 = arith.constant 0 : i32
    return %arg0, %c0_i32 : i32, i32
  }
  func.func @transform_1(%arg0: i32, %arg1: i32) -> (i32, i32) {
    %c0_i32 = arith.constant 0 : i32
    %c0_i32_0 = arith.constant 0 : i32
    return %c0_i32, %arg1 : i32, i32
  }
  func.func @transform_2(%arg0: i32, %arg1: i32) -> (i32, i32) {
    %c0_i32 = arith.constant 0 : i32
    %c0_i32_0 = arith.constant 0 : i32
    return %c0_i32, %arg1 : i32, i32
  }
  func.func @transform_3(%arg0: i32, %arg1: i32) -> (i32, i32) {
    %c0_i32 = arith.constant 0 : i32
    %c0_i32_0 = arith.constant 0 : i32
    return %arg1, %c0_i32 : i32, i32
  }
  func.func @transform_4(%arg0: i32, %arg1: i32) -> (i32, i32) {
    %c0_i32 = arith.constant 0 : i32
    %c0_i32_0 = arith.constant 0 : i32
    %c0_i32_1 = arith.constant 0 : i32
    return %c0_i32, %c0_i32_0 : i32, i32
  }
  func.func @transform_5(%arg0: i32, %arg1: i32) -> (i32, i32) {
    %c0_i32 = arith.constant 0 : i32
    %c0_i32_0 = arith.constant 0 : i32
    %c0_i32_1 = arith.constant 0 : i32
    return %c0_i32, %c0_i32_0 : i32, i32
  }
  func.func @transform_6(%arg0: i32, %arg1: i32) -> (i32, i32) {
    %c0_i32 = arith.constant 0 : i32
    %c0_i32_0 = arith.constant 0 : i32
    %c0_i32_1 = arith.constant 0 : i32
    return %c0_i32, %c0_i32_0 : i32, i32
  }
  func.func @transform_7(%arg0: i32, %arg1: i32) -> (i32, i32) {
    %c0_i32 = arith.constant 0 : i32
    %c0_i32_0 = arith.constant 0 : i32
    return %arg0, %c0_i32 : i32, i32
  }
}

</mosaic_0001>

<bundles_post_ra>
// kernel: tpu_custom_call.1
= control target key start
LH: loop header
LB: loop body
LE: loop exit
PB: predicated region body
PF: predicated region fallthrough
CT: control target
= control target key end

     0   :  { %12 = vsyncpa [#allocation4], 0  ;;  %s957_s0 = inlined_call_operand.hbm [shape: f32[16,128], index: 0, kind: input, shape index: {}]   ;;  %s958_s1 = inlined_call_operand.hbm [shape: f32[128,128], index: 1, kind: input, shape index: {}]   ;;  %s959_s2 = inlined_call_operand.hbm [shape: f32[1,128], index: 2, kind: input, shape index: {}]   ;;  %s960_s3 = inlined_call_operand.hbm [shape: f32[128,128], index: 3, kind: input, shape index: {}]   ;;  %s961_s4 = inlined_call_operand.hbm [shape: f32[1,128], index: 4, kind: input, shape index: {}]   ;;  %s962_s5 = inlined_call_operand.hbm [shape: f32[1,128], index: 5, kind: input, shape index: {}]   ;;  %s963_s6 = inlined_call_operand.hbm [shape: f32[1,128], index: 6, kind: input, shape index: {}]   ;;  %s964_s7 = inlined_call_operand.hbm [shape: f32[16,128], index: 7, kind: output, shape index: {}]  }
   0x1   :  { %13 = vsyncpa [#allocation7], 0 }
   0x2   :  { %14 = vsyncpa [#allocation10], 0 }
   0x3   :  { %15 = vsyncpa [#allocation13], 0 }
   0x4   :  { %16 = vsyncpa [#allocation5], 0  ;;  %s781_s24 = smov [#allocation6]   ;;  %s782_s26 = smov [#allocation9]  }
   0x5   :  { %s34_s25 = sshll.u32 %s781_s24, 4  ;;  %s56_s27 = sshll.u32 %s782_s26, 4  ;;  %s35_s25 = int_to_ptr.vmem [resolvable:$true] %s34_s25  ;;  %s831_s27 = int_to_ptr.vmem [resolvable:$true] %s56_s27 }
   0x6   :  { %s595_s30 = scalar_lea.hbm %s958_s1, 2048 }
   0x7   :  { %p596_p0 = scmp.ne.s32.totalorder %s958_s1, %s595_s30  ;;  %p599_p1 = scmp.lt.u32.totalorder %s595_s30, %s958_s1 }
   0x9   :  { %p601_p2 = pnand %p599_p1, %p596_p0 }
   0xb   :  { %604 = shalt.err (!%p601_p2)
}
   0xc   :  { %s605_s12 = scalar_lea.vmem %s35_s25, 2048  ;;  %p610_p4 = scmp.lt.s32.totalorder %s35_s25, %s35_s25 }
   0xd   :  { %p606_p3 = scmp.ne.s32.totalorder %s35_s25, %s605_s12  ;;  %p611_p5 = scmp.lt.s32.totalorder %s605_s12, %s605_s12 }
   0xf   :  { %p612_p6 = por %p611_p5, %p610_p4 }
  0x11   :  { %p613_p7 = pnand %p612_p6, %p606_p3 }
  0x13   :  { %616 = shalt.err (!%p613_p7)
}
  0x14   :  { %s783_s13 = smov 128   ;;  %s784_s14 = smov 8  }
  0x15   :  { %40 = dma.hbm_to_vmem [thread:$0]  %s958_s1, 2048, %s35_s25, [#allocation7], %s783_s13, %s783_s13, %s784_s14  }
  0x16   :  { %s617_s19 = scalar_lea.hbm %s960_s3, 2048 }
  0x17   :  { %p618_p8 = scmp.ne.s32.totalorder %s960_s3, %s617_s19  ;;  %p621_p9 = scmp.lt.u32.totalorder %s617_s19, %s960_s3 }
  0x19   :  { %p623_p10 = pnand %p621_p9, %p618_p8 }
  0x1b   :  { %626 = shalt.err (!%p623_p10)
}
  0x1c   :  { %s627_s24 = scalar_lea.vmem %s831_s27, 2048  ;;  %p632_p12 = scmp.lt.s32.totalorder %s831_s27, %s831_s27 }
  0x1d   :  { %p628_p11 = scmp.ne.s32.totalorder %s831_s27, %s627_s24  ;;  %p633_p13 = scmp.lt.s32.totalorder %s627_s24, %s627_s24 }
  0x1f   :  { %p634_p0 = por %p633_p13, %p632_p12 }
  0x21   :  { %p635_p1 = pnand %p634_p0, %p628_p11 }
  0x23   :  { %638 = shalt.err (!%p635_p1)
}
  0x24   :  { %62 = dma.hbm_to_vmem [thread:$0]  %s960_s3, 2048, %s831_s27, [#allocation10], %s783_s13, %s783_s13, %s784_s14  }
  0x25   :  { %s785_s26 = smov [#allocation12]   ;;  %s786_s29 = smov [#allocation3]  }
  0x26   :  { %s79_s28 = sshll.u32 %s785_s26, 4  ;;  %s22_s30 = sshll.u32 %s786_s29, 4  ;;  %s80_s28 = int_to_ptr.vmem [resolvable:$true] %s79_s28  ;;  %s868_s30 = int_to_ptr.vmem [resolvable:$true] %s22_s30 }
  0x27   :  { %s639_s10 = scalar_lea.hbm %s962_s5, 16 }
  0x28   :  { %p640_p2 = scmp.ne.s32.totalorder %s962_s5, %s639_s10  ;;  %p643_p3 = scmp.lt.u32.totalorder %s639_s10, %s962_s5 }
  0x2a   :  { %p645_p4 = pnand %p643_p3, %p640_p2 }
  0x2c   :  { %648 = shalt.err (!%p645_p4)
}
  0x2d   :  { %s649_s3 = scalar_lea.vmem %s80_s28, 16  ;;  %s653_s27 = scalar_lea.vmem %s80_s28, 32 }
  0x2e   :  { %p650_p5 = scmp.ne.s32.totalorder %s80_s28, %s649_s3  ;;  %p654_p6 = scmp.lt.s32.totalorder %s80_s28, %s80_s28 }
  0x2f   :  { %p655_p7 = scmp.lt.s32.totalorder %s653_s27, %s649_s3 }
  0x31   :  { %p656_p8 = por %p655_p7, %p654_p6 }
  0x33   :  { %p657_p9 = pnand %p656_p8, %p650_p5 }
  0x35   :  { %660 = shalt.err (!%p657_p9)
}
  0x36   :  { %82 = dma.hbm_to_vmem [thread:$0]  %s962_s5, 16, %s80_s28, [#allocation13]  }
  0x37   :  { %s661_s21 = scalar_lea.hbm %s957_s0, 256 }
  0x38   :  { %p662_p10 = scmp.ne.s32.totalorder %s957_s0, %s661_s21  ;;  %p665_p11 = scmp.lt.u32.totalorder %s661_s21, %s957_s0 }
  0x3a   :  { %p667_p12 = pnand %p665_p11, %p662_p10 }
  0x3c   :  { %670 = shalt.err (!%p667_p12)
}
  0x3d   :  { %s671_s25 = scalar_lea.vmem %s868_s30, 256  ;;  %p676_p0 = scmp.lt.s32.totalorder %s868_s30, %s868_s30 }
  0x3e   :  { %p672_p13 = scmp.ne.s32.totalorder %s868_s30, %s671_s25  ;;  %p677_p1 = scmp.lt.s32.totalorder %s671_s25, %s671_s25 }
  0x40   :  { %p678_p2 = por %p677_p1, %p676_p0 }
  0x42   :  { %p679_p3 = pnand %p678_p2, %p672_p13 }
  0x44   :  { %682 = shalt.err (!%p679_p3)
}
  0x45   :  { %28 = dma.hbm_to_vmem [thread:$0]  %s957_s0, 256, %s868_s30, [#allocation4], %s783_s13, %s783_s13, %s784_s14  }
  0x46   :  { %s787_s28 = smov [#allocation8]   ;;  %s788_s8 = smov [#allocation11]  }
  0x47   :  { %s47_s29 = sshll.u32 %s787_s28, 4  ;;  %s69_s9 = sshll.u32 %s788_s8, 4  ;;  %s48_s29 = int_to_ptr.vmem [resolvable:$true] %s47_s29  ;;  %s70_s9 = int_to_ptr.vmem [resolvable:$true] %s69_s9 }
  0x48   :  { %s683_s12 = scalar_lea.hbm %s959_s2, 16 }
  0x49   :  { %p684_p4 = scmp.ne.s32.totalorder %s959_s2, %s683_s12  ;;  %p687_p5 = scmp.lt.u32.totalorder %s683_s12, %s959_s2 }
  0x4b   :  { %p689_p6 = pnand %p687_p5, %p684_p4 }
  0x4d   :  { %692 = shalt.err (!%p689_p6)
}
  0x4e   :  { %s693_s0 = scalar_lea.vmem %s48_s29, 16  ;;  %s697_s30 = scalar_lea.vmem %s48_s29, 32 }
  0x4f   :  { %p694_p7 = scmp.ne.s32.totalorder %s48_s29, %s693_s0  ;;  %p698_p8 = scmp.lt.s32.totalorder %s48_s29, %s48_s29 }
  0x50   :  { %p699_p9 = scmp.lt.s32.totalorder %s697_s30, %s693_s0 }
  0x52   :  { %p700_p10 = por %p699_p9, %p698_p8 }
  0x54   :  { %p701_p11 = pnand %p700_p10, %p694_p7 }
  0x56   :  { %704 = shalt.err (!%p701_p11)
}
  0x57   :  { %50 = dma.hbm_to_vmem [thread:$0]  %s959_s2, 16, %s48_s29, [#allocation7]  }
  0x58   :  { %s705_s21 = scalar_lea.hbm %s961_s4, 16 }
  0x59   :  { %p706_p12 = scmp.ne.s32.totalorder %s961_s4, %s705_s21  ;;  %p709_p13 = scmp.lt.u32.totalorder %s705_s21, %s961_s4 }
  0x5b   :  { %p711_p0 = pnand %p709_p13, %p706_p12 }
  0x5d   :  { %714 = shalt.err (!%p711_p0)
}
  0x5e   :  { %s715_s25 = scalar_lea.vmem %s70_s9, 16  ;;  %s719_s5 = scalar_lea.vmem %s70_s9, 32 }
  0x5f   :  { %p716_p1 = scmp.ne.s32.totalorder %s70_s9, %s715_s25  ;;  %p720_p2 = scmp.lt.s32.totalorder %s70_s9, %s70_s9 }
  0x60   :  { %p721_p3 = scmp.lt.s32.totalorder %s719_s5, %s715_s25 }
  0x62   :  { %p722_p4 = por %p721_p3, %p720_p2 }
  0x64   :  { %p723_p5 = pnand %p722_p4, %p716_p1 }
  0x66   :  { %726 = shalt.err (!%p723_p5)
}
  0x67   :  { %72 = dma.hbm_to_vmem [thread:$0]  %s961_s4, 16, %s70_s9, [#allocation10]  }
  0x68   :  { %s789_s28 = smov [#allocation14]   ;;  %s727_s11 = scalar_lea.hbm %s963_s6, 16 }
  0x69   :  { %s89_s29 = sshll.u32 %s789_s28, 4  ;;  %p728_p6 = scmp.ne.s32.totalorder %s963_s6, %s727_s11  ;;  %s90_s29 = int_to_ptr.vmem [resolvable:$true] %s89_s29 }
  0x6a   :  { %p731_p7 = scmp.lt.u32.totalorder %s727_s11, %s963_s6 }
  0x6c   :  { %p733_p8 = pnand %p731_p7, %p728_p6 }
  0x6e   :  { %736 = shalt.err (!%p733_p8)
}
  0x6f   :  { %s737_s27 = scalar_lea.vmem %s90_s29, 16  ;;  %s741_s4 = scalar_lea.vmem %s90_s29, 32 }
  0x70   :  { %p738_p9 = scmp.ne.s32.totalorder %s90_s29, %s737_s27  ;;  %p742_p10 = scmp.lt.s32.totalorder %s90_s29, %s90_s29 }
  0x71   :  { %p743_p11 = scmp.lt.s32.totalorder %s741_s4, %s737_s27 }
  0x73   :  { %p744_p12 = por %p743_p11, %p742_p10 }
  0x75   :  { %p745_p13 = pnand %p744_p12, %p738_p9 }
  0x77   :  { %748 = shalt.err (!%p745_p13)
}
  0x78   :  { %92 = dma.hbm_to_vmem [thread:$0]  %s963_s6, 16, %s90_s29, [#allocation13]  }
  0x79   :  { %771 = dma.done.wait [#allocation4], 256  }
  0x7a   :  { %772 = vsyncadd [#allocation4], 4294967040 }
  0x7b   :  { %773 = dma.done.wait [#allocation7], 2064  }
  0x7c   :  { %774 = vsyncadd [#allocation7], 4294965232 }
  0x7d   :  { %775 = dma.done.wait [#allocation10], 2064  }
  0x7e   :  { %776 = vsyncadd [#allocation10], 4294965232 }
  0x7f   :  { %777 = dma.done.wait [#allocation13], 32  }
  0x80   :  { %778 = vsyncadd [#allocation13], 4294967264  ;;  %v122_v0 = vld [vmem:[#allocation6] sm:$0xff]  ;;  %v123_v1 = vld [vmem:[#allocation6 + $0x8] sm:$0xff]  ;;  %s790_s6 = smov [#allocation15]  }
  0x81   :  { %v124_v2 = vld [vmem:[#allocation6 + $0x10] sm:$0xff]  ;;  %v517_v3 = vpack.c.bf16 %v123_v1, %v122_v0  ;;  %v125_v4 = vld [vmem:[#allocation6 + $0x18] sm:$0xff]  ;;  %v126_v6 = vld [vmem:[#allocation6 + $0x20] sm:$0xff]  ;;  %v337_v0 = vlaneseq  ;;  %s392_s30 = sshll.u32 %s790_s6, 4  ;;  %s393_s30 = int_to_ptr.vmem [resolvable:$true] %s392_s30 }
  0x82   :  { %v521_v5 = vpack.c.bf16 %v125_v4, %v124_v2  ;;  %v127_v7 = vld [vmem:[#allocation6 + $0x28] sm:$0xff]  ;;  %v128_v9 = vld [vmem:[#allocation6 + $0x30] sm:$0xff]  ;;  %v129_v10 = vld [vmem:[#allocation6 + $0x38] sm:$0xff]  ;;  %s749_s17 = scalar_lea.vmem %s393_s30, 256  ;;  %p754_p1 = scmp.lt.s32.totalorder %s393_s30, %s393_s30 }
  0x83   :  { %518 = vmatprep.subr.bf16.mxu0 %v517_v3  ;;  %v525_v8 = vpack.c.bf16 %v127_v7, %v126_v6  ;;  %v938_v11 = vld [vmem:[#allocation3] sm:$0xff]  ;;  %v224_v12 = vld [vmem:[#allocation9] sm:$0xff]  ;;  %v227_v16 = vld [vmem:[#allocation9 + $0x18] sm:$0xff]  ;;  %v529_v20 = vpack.c.bf16 %v129_v10, %v128_v9  ;;  %v338_v1 = vand.u32 127, %v337_v0  ;;  %p750_p0 = scmp.ne.s32.totalorder %s393_s30, %s749_s17  ;;  %p755_p2 = scmp.lt.s32.totalorder %s749_s17, %s749_s17 }
  0x84   :  { %520 = vmatpush3.bf16.msra.mxu0 %v517_v3  ;;  %479 = vmatprep.mubr.f32.mxu0 %v938_v11  ;;  %v225_v13 = vld [vmem:[#allocation9 + $0x8] sm:$0xff]  ;;  %v226_v14 = vld [vmem:[#allocation9 + $0x10] sm:$0xff]  ;;  %v228_v18 = vld [vmem:[#allocation9 + $0x20] sm:$0xff] }
  0x85   :  { %522 = vmatprep.subr.bf16.mxu0 %v521_v5  ;;  %v549_v15 = vpack.c.bf16 %v225_v13, %v224_v12  ;;  %v553_v17 = vpack.c.bf16 %v227_v16, %v226_v14  ;;  %v229_v19 = vld [vmem:[#allocation9 + $0x28] sm:$0xff]  ;;  %v130_v21 = vld [vmem:[#allocation6 + $0x40] sm:$0xff]  ;;  %v230_v24 = vld [vmem:[#allocation9 + $0x30] sm:$0xff]  ;;  %vm339_vm0 = vcmp.lt.s32.totalorder %v338_v1, 32  ;;  %p756_p3 = por %p755_p2, %p754_p1 }
  0x86   :  { %v131_v22 = vld [vmem:[#allocation6 + $0x48] sm:$0xff]  ;;  %v557_v23 = vpack.c.bf16 %v229_v19, %v228_v18  ;;  %v231_v25 = vld [vmem:[#allocation9 + $0x38] sm:$0xff]  ;;  %v132_v27 = vld [vmem:[#allocation6 + $0x50] sm:$0xff] }
  0x87   :  { %550 = vmatprep.subr.bf16.mxu1 %v549_v15  ;;  %v533_v26 = vpack.c.bf16 %v131_v22, %v130_v21  ;;  %v133_v28 = vld [vmem:[#allocation6 + $0x58] sm:$0xff]  ;;  %v561_v29 = vpack.c.bf16 %v231_v25, %v230_v24  ;;  %v232_v30 = vld [vmem:[#allocation9 + $0x40] sm:$0xff]  ;;  %v233_v31 = vld [vmem:[#allocation9 + $0x48] sm:$0xff]  ;;  %p757_p4 = pnand %p756_p3, %p750_p0 }
  0x88   :  { %524 = vmatpush3.bf16.msra.mxu0 %v521_v5  ;;  %552 = vmatpush3.bf16.msra.mxu1 %v549_v15  ;;  %v537_v32 = vpack.c.bf16 %v133_v28, %v132_v27  ;;  %v134_v33 = vld [vmem:[#allocation6 + $0x60] sm:$0xff]  ;;  %v135_v34 = vld [vmem:[#allocation6 + $0x68] sm:$0xff]  ;;  %v565_v35 = vpack.c.bf16 %v233_v31, %v232_v30  ;;  %v234_v36 = vld [vmem:[#allocation9 + $0x50] sm:$0xff] }
  0x89   :  { %526 = vmatprep.subr.bf16.mxu0 %v525_v8  ;;  %554 = vmatprep.subr.bf16.mxu1 %v553_v17  ;;  %v235_v37 = vld [vmem:[#allocation9 + $0x58] sm:$0xff]  ;;  %v541_v38 = vpack.c.bf16 %v135_v34, %v134_v33  ;;  %v136_v39 = vld [vmem:[#allocation6 + $0x70] sm:$0xff]  ;;  %v236_v42 = vld [vmem:[#allocation9 + $0x60] sm:$0xff] }
  0x8a   :  { %v137_v40 = vld [vmem:[#allocation6 + $0x78] sm:$0xff]  ;;  %v569_v41 = vpack.c.bf16 %v235_v37, %v234_v36  ;;  %v237_v43 = vld [vmem:[#allocation9 + $0x68] sm:$0xff]  ;;  %v407_v50 = vld [vmem:[#allocation8] ss:$0 sm:$0xff] }
  0x8b   :  { %v545_v44 = vpack.c.bf16 %v137_v40, %v136_v39  ;;  %v573_v45 = vpack.c.bf16 %v237_v43, %v236_v42  ;;  %v121_v46 = vld [vmem:[#allocation3 + $0x8] sm:$0xff]  ;;  %v408_v57 = vld [vmem:[#allocation11] ss:$0 sm:$0xff]  ;;  %v409_v19 = vld [vmem:[#allocation12] ss:$0 sm:$0xff] }
  0x8c   :  { %528 = vmatpush3.bf16.msra.mxu0 %v525_v8  ;;  %556 = vmatpush3.bf16.msra.mxu1 %v553_v17  ;;  %v238_v47 = vld [vmem:[#allocation9 + $0x70] sm:$0xff]  ;;  %v239_v48 = vld [vmem:[#allocation9 + $0x78] sm:$0xff]  ;;  %v410_v21 = vld [vmem:[#allocation14] ss:$0 sm:$0xff] }
  0x8d   :  { %530 = vmatprep.subr.bf16.mxu0 %v529_v20  ;;  %558 = vmatprep.subr.bf16.mxu1 %v557_v23  ;;  %v577_v49 = vpack.c.bf16 %v239_v48, %v238_v47 }
  0x90   :  { %532 = vmatpush3.bf16.msra.mxu0 %v529_v20  ;;  %560 = vmatpush3.bf16.msra.mxu1 %v557_v23 }
  0x91   :  { %534 = vmatprep.subr.bf16.mxu0 %v533_v26  ;;  %562 = vmatprep.subr.bf16.mxu1 %v561_v29 }
  0x94   :  { %536 = vmatpush3.bf16.msra.mxu0 %v533_v26  ;;  %564 = vmatpush3.bf16.msra.mxu1 %v561_v29 }
  0x95   :  { %538 = vmatprep.subr.bf16.mxu0 %v537_v32  ;;  %566 = vmatprep.subr.bf16.mxu1 %v565_v35 }
  0x98   :  { %540 = vmatpush3.bf16.msra.mxu0 %v537_v32  ;;  %568 = vmatpush3.bf16.msra.mxu1 %v565_v35 }
  0x99   :  { %542 = vmatprep.subr.bf16.mxu0 %v541_v38  ;;  %570 = vmatprep.subr.bf16.mxu1 %v569_v41 }
  0x9c   :  { %544 = vmatpush3.bf16.msra.mxu0 %v541_v38  ;;  %572 = vmatpush3.bf16.msra.mxu1 %v569_v41 }
  0x9d   :  { %546 = vmatprep.subr.bf16.mxu0 %v545_v44  ;;  %574 = vmatprep.subr.bf16.mxu1 %v573_v45 }
  0xa0   :  { %548 = vmatpush3.bf16.msra.mxu0 %v545_v44  ;;  %576 = vmatpush3.bf16.msra.mxu1 %v573_v45 }
  0xa1   :  { %578 = vmatprep.subr.bf16.mxu1 %v577_v49 }
  0xa3   :  { %480 = vmatmul.mubr.f32.vlgmr.msra.gmra.mrb[0].mxu0 %v121_v46 }
  0xa4   :  { %580 = vmatpush3.bf16.msra.mxu1 %v577_v49 }
 0x176   :  { %v481_v51 = vpop.f32.mrb[0].mxu0 }
 0x177   :  { %v217_v52 = vadd.f32 %v481_v51, %v407_v50  ;;  %v211_v53 = vpop.f32.mrb[1].mxu0 }
 0x178   :  { %v212_v54 = vadd.f32 %v407_v50, %v211_v53 }
 0x179   :  { %v221_v56 = vmax.f32 %v217_v52, 0.0 }
 0x17a   :  { %v220_v55 = vmax.f32 %v212_v54, 0.0 }
 0x17c   :  { %514 = vmatprep.mubr.f32.mxu1 %v220_v55 }
 0x17d   :  { %515 = vmatmul.mubr.f32.vlgmr.msra.gmra.mrb[0].mxu1 %v221_v56 }
 0x250   :  { %v516_v58 = vpop.f32.mrb[0].mxu1 }
 0x251   :  { %v306_v59 = vpop.f32.mrb[1].mxu1  ;;  %v332_v61 = vadd.f32 %v516_v58, %v408_v57 }
 0x252   :  { %v331_v60 = vadd.f32 %v408_v57, %v306_v59 }
 0x253   :  { %v336_v63 = vadd.f32 %v332_v61, %v121_v46 }
 0x254   :  { %v335_v62 = vadd.f32 %v331_v60, %v938_v11 }
 0x256   :  { %340 = vadd.xlane.f32.xlu0 %v335_v62 }
 0x25a   :  { %342 = vadd.xlane.f32.xlu0 %v336_v63 }
 0x2e3   :  { %v341_v2 = vpop.xlane.xlu0 %340 }
 0x2e4   :  { %v345_v3 = vmul.f32 0.03125, %v341_v2 }
 0x2e6   :  { %v347_v4 = vsub.f32 %v335_v62, %v345_v3 }
 0x2e7   :  { %v343_v5 = vpop.xlane.xlu0 %342 }
 0x2e8   :  { %v346_v6 = vmul.f32 0.03125, %v343_v5  ;;  %v351_v7 = vsel %vm339_vm0, %v347_v4, 0.0 }
 0x2e9   :  { %v353_v8 = vmul.f32 %v351_v7, %v351_v7 }
 0x2ea   :  { %v348_v9 = vsub.f32 %v336_v63, %v346_v6 }
 0x2eb   :  { %355 = vadd.xlane.f32.xlu1 %v353_v8 }
 0x2ec   :  { %v352_v10 = vsel %vm339_vm0, %v348_v9, 0.0 }
 0x2ed   :  { %v354_v12 = vmul.f32 %v352_v10, %v352_v10 }
 0x2ef   :  { %357 = vadd.xlane.f32.xlu1 %v354_v12 }
 0x378   :  { %v356_v13 = vpop.xlane.xlu1 %355 }
 0x379   :  { %v359_v11 = vmul.f32 0.03125, %v356_v13 }
 0x37b   :  { %v361_v14 = vadd.f32 1e-05, %v359_v11 }
 0x37c   :  { %v358_v15 = vpop.xlane.xlu1 %357 }
 0x37d   :  { %591 = vrsqrt.f32 %v361_v14  ;;  %v360_v16 = vmul.f32 0.03125, %v358_v15 }
 0x37f   :  { %v362_v17 = vadd.f32 1e-05, %v360_v16 }
 0x381   :  { %593 = vrsqrt.f32 %v362_v17 }
 0x387   :  { %v592_v18 = vpop.eup %591 }
 0x388   :  { %v365_v20 = vmul.f32 %v592_v18, %v351_v7 }
 0x38a   :  { %v374_v22 = vmul.f32 %v409_v19, %v365_v20 }
 0x38b   :  { %v594_v23 = vpop.eup %593 }
 0x38c   :  { %v366_v24 = vmul.f32 %v594_v23, %v352_v10  ;;  %v383_v25 = vadd.f32 %v410_v21, %v374_v22 }
 0x38e   :  { %v375_v26 = vmul.f32 %v409_v19, %v366_v24  ;;  %385 = vst [vmem:[#allocation15] sm:$0xff] %v383_v25 }
 0x390   :  { %v384_v27 = vadd.f32 %v410_v21, %v375_v26 }
 0x392   :  { %386 = vst [vmem:[#allocation15 + $0x8] sm:$0xff] %v384_v27 }
 0x393   :  { %760 = shalt.err (!%p757_p4)
}
 0x394   :  { %s761_s20 = scalar_lea.hbm %s964_s7, 256 }
 0x395   :  { %p762_p5 = scmp.ne.s32.totalorder %s964_s7, %s761_s20  ;;  %p765_p6 = scmp.lt.u32.totalorder %s761_s20, %s964_s7 }
 0x397   :  { %p767_p7 = pnand %p765_p6, %p762_p5 }
 0x399   :  { %770 = shalt.err (!%p767_p7)
}
 0x39a   :  { %398 = dma.vmem_to_hbm [thread:$0]  %s393_s30, 256, %s964_s7, [#allocation5], %s783_s13, %s783_s13, %s784_s14  }
 0x39b   :  { %779 = dma.done.wait [#allocation5], 256  }
 0x39c   :  { %780 = vsyncadd [#allocation5], 4294967040 }
 0x39d   :  { %402 = vsyncpa [#allocation4], 1 }
 0x39e   :  { %403 = vsyncpa [#allocation7], 1 }
 0x39f   :  { %404 = vsyncpa [#allocation10], 1 }
 0x3a0   :  { %405 = vsyncpa [#allocation13], 1 }
 0x3a1   :  { %406 = vsyncpa [#allocation5], 1 }

</bundles_post_ra>
